<compile_context>
chip_gen: v7x
topology: tpu7x:2x2x1
jax: 0.10.0
libtpu: 0.0.40
codegen_flags: <defaults>
</compile_context>

<pallas_src>
import math
import functools

import jax
import jax.numpy as jnp
from jax.experimental import pallas as pl
from jax.experimental.pallas import tpu as pltpu


# --------------------------- Pallas kernel (one x2 stage) -------------------
def _stage_kernel(x_ref, w_ref, b_ref, a_ref, o_ref, xp_ref, *, C):
    """PReLU -> weight-normed 3x3 conv (pad=1) -> PixelShuffle(2), one image.

    x_ref : (1, H, W*C)          lane-flattened NHWC input (unpadded)
    w_ref : (3, (W+2)*C, 4*W*C)  banded conv weights, one matrix per kh tap;
                                 columns already in shuffled (i, w, j, c) order
    b_ref : (1, 4*W*C)           bias tiled/permuted to the same column order
    a_ref : (1,)   SMEM          PReLU slope (single shared parameter)
    o_ref : (1, H, 4*W*C)        pixel-shuffled output (free-reshapes to
                                 (2H, 2W, C) in the wrapper)
    xp_ref: (H+2, (W+2)*C) f32   VMEM scratch: zero-padded, PReLU'd input
    """
    H = x_ref.shape[1]
    WC = x_ref.shape[2]

    alpha = a_ref[0]
    x = x_ref[0].astype(jnp.float32)                         # (H, W*C)
    x = jnp.maximum(x, 0.0) + alpha * jnp.minimum(x, 0.0)    # PReLU (prelu(0)=0)

    # zero-pad inside VMEM: no HBM pad round trip
    xp_ref[...] = jnp.zeros_like(xp_ref)
    xp_ref[1:H + 1, C:C + WC] = x

    # 3x3 conv + bias + PixelShuffle(2), fused:
    # one matmul per vertical tap; horizontal taps / channel mix / shuffle
    # permutation are folded into the banded weight matrices.
    acc = jnp.dot(xp_ref[0:H, :], w_ref[0],
                  preferred_element_type=jnp.float32)
    acc = acc + jnp.dot(xp_ref[1:H + 1, :], w_ref[1],
                        preferred_element_type=jnp.float32)
    acc = acc + jnp.dot(xp_ref[2:H + 2, :], w_ref[2],
                        preferred_element_type=jnp.float32)
    acc = acc + b_ref[0][None, :]

    # single lane-dense store of the already-shuffled rows
    o_ref[0] = acc.astype(o_ref.dtype)


def _stage_pallas(x_flat, bw, b_flat, alpha_arr, C):
    """x_flat: (N, H, W*C); bw: (3, (W+2)*C, 4*W*C); b_flat: (1, 4*W*C)."""
    N, H, WC = x_flat.shape
    W = WC // C
    R = (W + 2) * C
    ncol = 4 * W * C

    kernel = functools.partial(_stage_kernel, C=C)
    out = pl.pallas_call(
        kernel,
        out_shape=jax.ShapeDtypeStruct((N, H, ncol), x_flat.dtype),
        grid_spec=pltpu.PrefetchScalarGridSpec(
            num_scalar_prefetch=0,
            grid=(N,),
            in_specs=[
                pl.BlockSpec((1, H, WC), lambda n: (n, 0, 0)),
                pl.BlockSpec((3, R, ncol), lambda n: (0, 0, 0)),
                pl.BlockSpec((1, ncol), lambda n: (0, 0)),
                pl.BlockSpec(memory_space=pltpu.MemorySpace.SMEM),
            ],
            out_specs=pl.BlockSpec((1, H, ncol), lambda n: (n, 0, 0)),
            scratch_shapes=[pltpu.VMEM((H + 2, R), jnp.float32)],
        ),
        compiler_params=pltpu.CompilerParams(
            dimension_semantics=("parallel",),
            vmem_limit_bytes=32 * 1024 * 1024,
        ),
    )(x_flat, bw, b_flat, alpha_arr)
    return out


# --------------------- wrapper-side (one-time) weight prep ------------------
def _banded_weight_and_bias(w_eff, bias, W):
    """Fold horizontal taps + pixel-shuffle permutation into banded matrices.

    w_eff: (3, 3, Cin, 4*Cin) in (kh, kw, cin, och) with och = c*4 + i*2 + j.
    Returns bw (3, (W+2)*Cin, 4*W*C) f32 and b_flat (1, 4*W*C) f32 where the
    column index is i*(2*W*C) + w*(2*C) + j*C + c  (shuffled output order).
    """
    Cin = w_eff.shape[2]
    OC = w_eff.shape[3]
    C = OC // 4
    # (kh, kw, cin, c, i, j) -> (kh, kw, cin, i, j, c)
    wp = jnp.transpose(w_eff.reshape(3, 3, Cin, C, 2, 2), (0, 1, 2, 4, 5, 3))

    R = (W + 2) * Cin
    ncol = 4 * W * C
    shape7 = (3, W, 3, Cin, 2, 2, C)

    kh = jnp.arange(3)[:, None, None, None, None, None, None]
    w_ = jnp.arange(W)[None, :, None, None, None, None, None]
    kw = jnp.arange(3)[None, None, :, None, None, None, None]
    ci = jnp.arange(Cin)[None, None, None, :, None, None, None]
    ii = jnp.arange(2)[None, None, None, None, :, None, None]
    jj = jnp.arange(2)[None, None, None, None, None, :, None]
    cc = jnp.arange(C)[None, None, None, None, None, None, :]

    rows = jnp.broadcast_to((w_ + kw) * Cin + ci, shape7)
    cols = jnp.broadcast_to(ii * (2 * W * C) + w_ * (2 * C) + jj * C + cc,
                            shape7)
    khb = jnp.broadcast_to(kh, shape7)
    vals = jnp.broadcast_to(wp[:, None], shape7).astype(jnp.float32)

    bw = jnp.zeros((3, R, ncol), jnp.float32).at[khb, rows, cols].set(vals)

    # bias in shuffled, w-tiled order: b_flat[i*2WC + w*2C + j*C + c] = b[och]
    bp = jnp.transpose(bias.reshape(C, 2, 2), (1, 2, 0))      # (i, j, c)
    b_flat = jnp.broadcast_to(bp[:, None, :, :], (2, W, 2, C))
    b_flat = b_flat.reshape(1, ncol).astype(jnp.float32)
    return bw, b_flat


def make_upsample_params(key, n_channels, scale):
    """Deterministic parameter init matching the PyTorch module's shapes.

    For each x2 stage: PReLU slope (scalar, 0.25 default), weight-norm conv
    v: (4C, C, 3, 3), g: (4C,), bias: (4C,)."""
    n_stages = int(math.log(scale, 2))
    params = []
    for _ in range(n_stages):
        kv, kg, kb, key = jax.random.split(key, 4)
        OC, IC = 4 * n_channels, n_channels
        v = jax.random.normal(kv, (OC, IC, 3, 3), jnp.float32) * 0.1
        g = jax.random.uniform(kg, (OC,), jnp.float32, 0.5, 1.5)
        bias = jax.random.normal(kb, (OC,), jnp.float32) * 0.01
        # weight-norm: w = g * v / ||v||  (norm over dims (1,2,3) per out chan)
        v_norm = jnp.sqrt(jnp.sum(v * v, axis=(1, 2, 3), keepdims=True))
        w_oihw = g.reshape(OC, 1, 1, 1) * v / v_norm
        w = jnp.transpose(w_oihw, (2, 3, 1, 0))               # (3,3,IC,OC)
        alpha = jnp.float32(0.25)                             # nn.PReLU() init
        params.append(dict(w=w, w_oihw=w_oihw, b=bias, alpha=alpha))
    return params


@functools.partial(jax.jit, static_argnames=("scale",))
def upsample_block_forward(x_nchw, params, scale):
    """Forward pass of _UpsampleBlock for scale in {2, 4, 8} (NCHW in/out)."""
    if scale not in (2, 4, 8):
        # TODO(synk): scale==3 / scale==5 (PixelShuffle(3)/(5)) not implemented.
        raise NotImplementedError("only scale in {2,4,8} is implemented")

    x = jnp.transpose(x_nchw, (0, 2, 3, 1))                   # NCHW -> NHWC
    N, H, W, C = x.shape
    x = x.reshape(N, H, W * C)                                # free reshape

    for p in params:
        bw, b_flat = _banded_weight_and_bias(p["w"], p["b"], W)
        alpha_arr = jnp.asarray(p["alpha"], jnp.float32).reshape(1)
        y = _stage_pallas(x, bw, b_flat, alpha_arr, C)        # (N, H, 4*W*C)
        H, W = 2 * H, 2 * W
        x = y.reshape(N, H, W * C)                            # free reshape

    x = x.reshape(N, H, W, C)
    return jnp.transpose(x, (0, 3, 1, 2))                     # NHWC -> NCHW


# ---------------- pure-JAX reference (for correctness check) ----------------
def _reference_forward(x_nchw, params):
    x = x_nchw
    for p in params:
        a = p["alpha"]
        x = jnp.maximum(x, 0.0) + a * jnp.minimum(x, 0.0)
        y = jax.lax.conv_general_dilated(
            x, p["w_oihw"], window_strides=(1, 1), padding=((1, 1), (1, 1)),
            dimension_numbers=("NCHW", "OIHW", "NCHW"))
        y = y + p["b"].reshape(1, -1, 1, 1)
        # PixelShuffle(2), NCHW
        N, CRR, H, W = y.shape
        C = CRR // 4
        y = y.reshape(N, C, 2, 2, H, W)
        y = jnp.transpose(y, (0, 1, 4, 2, 5, 3)).reshape(N, C, H * 2, W * 2)
        x = y
    return x


if __name__ == "__main__":
    n_channels = 4
    scale = 2            # module supports 2/4/8 via repeated x2 stages
    N, H, W = 2, 16, 16

    key = jax.random.PRNGKey(0)
    kx, kp = jax.random.split(key)
    x = jax.random.normal(kx, (N, n_channels, H, W), jnp.float32)
    params = make_upsample_params(kp, n_channels, scale)

    out = upsample_block_forward(x, params, scale)
    out = jax.block_until_ready(out)

    ref = _reference_forward(x, params)
    assert out.shape == (N, n_channels, H * scale, W * scale), out.shape
    assert jnp.allclose(out, ref, rtol=1e-4, atol=1e-4), float(
        jnp.max(jnp.abs(out - ref)))

    print("KERNEL_OK")
</pallas_src>

<mosaic_0001>
module attributes {stable_mosaic.version = 11 : i64} {
  func.func @_stage_kernel(%arg0: i32, %arg1: memref<1x16x64xf32, #tpu.memory_space<vmem>>, %arg2: memref<3x72x256xf32, #tpu.memory_space<vmem>>, %arg3: memref<1x256xf32, #tpu.memory_space<vmem>>, %arg4: memref<1xf32, #tpu.memory_space<smem>>, %arg5: memref<1x16x256xf32, #tpu.memory_space<vmem>>, %arg6: memref<18x72xf32, #tpu.memory_space<vmem>>) attributes {dimension_semantics = [#tpu.dimension_semantics<parallel>], iteration_bounds = array<i64: 2>, scalar_prefetch = 0 : i64, scratch_operands = 1 : i64, tpu.core_type = #tpu.core_type<tc>, window_params = [{transform_indices = @transform_0, window_bounds = array<i64: 1, 16, 64>}, {pipeline_mode = #tpu.pipeline_mode<synchronous>, transform_indices = @transform_1, window_bounds = array<i64: 3, 72, 256>}, {pipeline_mode = #tpu.pipeline_mode<synchronous>, transform_indices = @transform_2, window_bounds = array<i64: 1, 256>}, {transform_indices = @transform_3, window_bounds = array<i64: 1>}, {transform_indices = @transform_4, window_bounds = array<i64: 1, 16, 256>}]} {
    %c0 = arith.constant 0 : index
    %0 = memref.load %arg4[%c0] : memref<1xf32, #tpu.memory_space<smem>>
    %c0_0 = arith.constant 0 : index
    %c0_1 = arith.constant 0 : index
    %c0_2 = arith.constant 0 : index
    %1 = vector.load %arg1[%c0_0, %c0_1, %c0_2] : memref<1x16x64xf32, #tpu.memory_space<vmem>>, vector<1x16x64xf32>
    %2 = vector.shape_cast %1 : vector<1x16x64xf32> to vector<16x64xf32>
    %cst = arith.constant 0.000000e+00 : f32
    %3 = vector.broadcast %cst : f32 to vector<16x64xf32>
    %4 = arith.maximumf %2, %3 : vector<16x64xf32>
    %cst_3 = arith.constant 0.000000e+00 : f32
    %5 = vector.broadcast %cst_3 : f32 to vector<16x64xf32>
    %6 = arith.minimumf %2, %5 : vector<16x64xf32>
    %7 = vector.broadcast %0 : f32 to vector<16x64xf32>
    %8 = arith.mulf %7, %6 : vector<16x64xf32>
    %9 = arith.addf %4, %8 : vector<16x64xf32>
    %cst_4 = arith.constant 0.000000e+00 : f32
    %10 = vector.broadcast %cst_4 : f32 to vector<18x72xf32>
    %c0_5 = arith.constant 0 : index
    %c0_6 = arith.constant 0 : index
    %11 = vector.load %arg6[%c0_5, %c0_6] : memref<18x72xf32, #tpu.memory_space<vmem>>, vector<18x72xf32>
    tpu.vector_store %arg6[%c0_5, %c0_6], %10 {strides = array<i32>} : memref<18x72xf32, #tpu.memory_space<vmem>>, vector<18x72xf32>,
    %c1 = arith.constant 1 : index
    %c4 = arith.constant 4 : index
    %12 = vector.load %arg6[%c1, %c4] : memref<18x72xf32, #tpu.memory_space<vmem>>, vector<16x64xf32>
    tpu.vector_store %arg6[%c1, %c4], %9 {strides = array<i32>} : memref<18x72xf32, #tpu.memory_space<vmem>>, vector<16x64xf32>,
    %c0_7 = arith.constant 0 : index
    %c0_8 = arith.constant 0 : index
    %13 = vector.load %arg6[%c0_7, %c0_8] : memref<18x72xf32, #tpu.memory_space<vmem>>, vector<16x72xf32>
    %c0_9 = arith.constant 0 : index
    %c0_10 = arith.constant 0 : index
    %c0_11 = arith.constant 0 : index
    %14 = vector.load %arg2[%c0_9, %c0_10, %c0_11] : memref<3x72x256xf32, #tpu.memory_space<vmem>>, vector<1x72x256xf32>
    %15 = vector.shape_cast %14 : vector<1x72x256xf32> to vector<72x256xf32>
    %cst_12 = arith.constant dense<0.000000e+00> : vector<16x256xf32>
    %16 = tpu.matmul %13, %15, %cst_12 {dimension_numbers = #tpu.dot_dimension_numbers<[1], [0], [0], [1], [0, 0, 1, 1], [], []>} : vector<16x72xf32>, vector<72x256xf32>, vector<16x256xf32> -> vector<16x256xf32>
    %c1_13 = arith.constant 1 : index
    %c0_14 = arith.constant 0 : index
    %17 = vector.load %arg6[%c1_13, %c0_14] : memref<18x72xf32, #tpu.memory_space<vmem>>, vector<16x72xf32>
    %c1_15 = arith.constant 1 : index
    %c0_16 = arith.constant 0 : index
    %c0_17 = arith.constant 0 : index
    %18 = vector.load %arg2[%c1_15, %c0_16, %c0_17] : memref<3x72x256xf32, #tpu.memory_space<vmem>>, vector<1x72x256xf32>
    %19 = vector.shape_cast %18 : vector<1x72x256xf32> to vector<72x256xf32>
    %cst_18 = arith.constant dense<0.000000e+00> : vector<16x256xf32>
    %20 = tpu.matmul %17, %19, %cst_18 {dimension_numbers = #tpu.dot_dimension_numbers<[1], [0], [0], [1], [0, 0, 1, 1], [], []>} : vector<16x72xf32>, vector<72x256xf32>, vector<16x256xf32> -> vector<16x256xf32>
    %21 = arith.addf %16, %20 : vector<16x256xf32>
    %c2 = arith.constant 2 : index
    %c0_19 = arith.constant 0 : index
    %22 = vector.load %arg6[%c2, %c0_19] : memref<18x72xf32, #tpu.memory_space<vmem>>, vector<16x72xf32>
    %c2_20 = arith.constant 2 : index
    %c0_21 = arith.constant 0 : index
    %c0_22 = arith.constant 0 : index
    %23 = vector.load %arg2[%c2_20, %c0_21, %c0_22] : memref<3x72x256xf32, #tpu.memory_space<vmem>>, vector<1x72x256xf32>
    %24 = vector.shape_cast %23 : vector<1x72x256xf32> to vector<72x256xf32>
    %cst_23 = arith.constant dense<0.000000e+00> : vector<16x256xf32>
    %25 = tpu.matmul %22, %24, %cst_23 {dimension_numbers = #tpu.dot_dimension_numbers<[1], [0], [0], [1], [0, 0, 1, 1], [], []>} : vector<16x72xf32>, vector<72x256xf32>, vector<16x256xf32> -> vector<16x256xf32>
    %26 = arith.addf %21, %25 : vector<16x256xf32>
    %c0_24 = arith.constant 0 : index
    %c0_25 = arith.constant 0 : index
    %27 = vector.load %arg3[%c0_24, %c0_25] : memref<1x256xf32, #tpu.memory_space<vmem>>, vector<1x256xf32>
    %28 = vector.shape_cast %27 : vector<1x256xf32> to vector<256xf32>
    %29 = vector.shape_cast %28 : vector<256xf32> to vector<1x256xf32>
    %30 = vector.broadcast %29 : vector<1x256xf32> to vector<16x256xf32>
    %31 = arith.addf %26, %30 : vector<16x256xf32>
    %c0_26 = arith.constant 0 : index
    %c0_27 = arith.constant 0 : index
    %c0_28 = arith.constant 0 : index
    %32 = vector.load %arg5[%c0_26, %c0_27, %c0_28] : memref<1x16x256xf32, #tpu.memory_space<vmem>>, vector<1x16x256xf32>
    %33 = vector.shape_cast %32 : vector<1x16x256xf32> to vector<16x256xf32>
    %34 = vector.shape_cast %31 : vector<16x256xf32> to vector<1x16x256xf32>
    tpu.vector_store %arg5[%c0_26, %c0_27, %c0_28], %34 {strides = array<i32>} : memref<1x16x256xf32, #tpu.memory_space<vmem>>, vector<1x16x256xf32>,
    return
  }
  func.func @transform_0(%arg0: i32) -> (i32, i32, i32) {
    %c0_i32 = arith.constant 0 : i32
    %c0_i32_0 = arith.constant 0 : i32
    %c0_i32_1 = arith.constant 0 : i32
    return %arg0, %c0_i32, %c0_i32_0 : i32, i32, i32
  }
  func.func @transform_1(%arg0: i32) -> (i32, i32, i32) {
    %c0_i32 = arith.constant 0 : i32
    %c0_i32_0 = arith.constant 0 : i32
    %c0_i32_1 = arith.constant 0 : i32
    %c0_i32_2 = arith.constant 0 : i32
    return %c0_i32, %c0_i32_0, %c0_i32_1 : i32, i32, i32
  }
  func.func @transform_2(%arg0: i32) -> (i32, i32) {
    %c0_i32 = arith.constant 0 : i32
    %c0_i32_0 = arith.constant 0 : i32
    %c0_i32_1 = arith.constant 0 : i32
    return %c0_i32, %c0_i32_0 : i32, i32
  }
  func.func @transform_3(%arg0: i32) -> i32 {
    %c0_i32 = arith.constant 0 : i32
    %c0_i32_0 = arith.constant 0 : i32
    return %c0_i32 : i32
  }
  func.func @transform_4(%arg0: i32) -> (i32, i32, i32) {
    %c0_i32 = arith.constant 0 : i32
    %c0_i32_0 = arith.constant 0 : i32
    %c0_i32_1 = arith.constant 0 : i32
    return %arg0, %c0_i32, %c0_i32_0 : i32, i32, i32
  }
}

</mosaic_0001>

<bundles_post_ra>
// kernel: upsample_block_forward.1
= control target key start
LH: loop header
LB: loop body
LE: loop exit
PB: predicated region body
PF: predicated region fallthrough
CT: control target
= control target key end

     0   :  { %s786_s17 = smov 0   ;;  %s992_s0 = inlined_call_operand.vmem [shape: f32[2,16,64], index: 0, kind: input, shape index: {}]   ;;  %s993_s1 = inlined_call_operand.vmem [shape: f32[3,72,256], index: 1, kind: input, shape index: {}]   ;;  %s994_s2 = inlined_call_operand.vmem [shape: f32[1,256], index: 2, kind: input, shape index: {}]   ;;  %s995_s3 = inlined_call_operand.<no memory space> [shape: f32[1], index: 3, kind: input, shape index: {}]   ;;  %s996_s4 = inlined_call_operand.vmem [shape: f32[2,16,256], index: 4, kind: output, shape index: {}]  }
   0x1   :  { %9 = sst [smem:[#allocation3]] %s995_s3 }
   0x2 LB: > { %s617_s18 = sadd.s32 4294967295, %s754_s17   ;;  %p621_p0 = scmp.ge.s32.totalorder %s754_s17, 1  ;;  %s754_s17 = sphi %s786_s17, %s15_s17  }
   0x3   : > { %p163_p1 = scmp.lt.s32.totalorder %s754_s17, 3 }
   0x5   : > { %p164_p2 = pnand %p621_p0, %p163_p1 }
   0x6   : > { %p189_p3 = scmp.lt.s32.totalorder (!%p164_p2), %s617_s18, 1  ;;  %s794_s19 = sld [smem:[#allocation3]] (!%p164_p2)  ;;  %v627_v0 = vld [vmem:[%s993_s1 + $0x98] sm:$0xff] (!%p164_p2)  ;;  %v629_v1 = vld [vmem:[%s993_s1 + $0xa8] sm:$0xff] (!%p164_p2)  ;;  %v626_v5 = vld [vmem:[%s993_s1 + $0x90] sm:$0xff] (!%p164_p2)  ;;  %vm211_vm0 = vcmask (!%p164_p2), 588800  }
   0x7   : > { %167 = sbr.rel (%p164_p2) target bundleno = 384 (0x180), region = 36  ;;  %v230_v2 = vld [vmem:[%s993_s1 + $0x8] sm:$0xff] (!%p164_p2)  ;;  %v672_v3 = vpack.c.bf16 (!%p164_p2), %v629_v1, %v627_v0  ;;  %v232_v4 = vld [vmem:[%s993_s1 + $0x18] sm:$0xff] (!%p164_p2)  ;;  %v628_v6 = vld [vmem:[%s993_s1 + $0xa0] sm:$0xff] (!%p164_p2)  ;;  %v756_v12 = vmov (!%p164_p2), 0.0   ;;  %vm214_vm1 = vcmask (!%p164_p2), 582656  }
   0x8   : > { %v688_v7 = vpack.c.bf16 (!%p164_p2), %v232_v4, %v230_v2  ;;  %v674_v8 = vpack.c.bf16 (!%p164_p2), %v628_v6, %v626_v5  ;;  %v229_v9 = vld [vmem:[%s993_s1] sm:$0xff] (!%p164_p2)  ;;  %v231_v10 = vld [vmem:[%s993_s1 + $0x10] sm:$0xff] (!%p164_p2)  ;;  %v631_v11 = vld [vmem:[%s993_s1 + $0xb8] sm:$0xff] (!%p164_p2)  ;;  %212 = vst.msk [vmem:[#allocation2] sm:$0xff] (!%p164_p2), %vm211_vm0, %v756_v12  ;;  %338 = vmatprep.mubr.f32.mxu1 (!%p164_p2), %v756_v12  ;;  %421 = vmatprep.mubr.f32.mxu0 (!%p164_p2), %v756_v12  ;;  %s757_s12 = smov (!%p164_p2), 4   ;;  %vm224_vm2 = vcmask (!%p164_p2), 556064  }
   0x9   : > { %213 = vst.msk [vmem:[#allocation2 + $0x8] sm:$0xff] (!%p164_p2), %vm211_vm0, %v756_v12  ;;  %673 = vmatprep.subr.bf16.mxu1 (!%p164_p2), %v672_v3  ;;  %v690_v13 = vpack.c.bf16 (!%p164_p2), %v231_v10, %v229_v9  ;;  %v633_v14 = vld [vmem:[%s993_s1 + $0xc8] sm:$0xff] (!%p164_p2)  ;;  %v236_v16 = vld [vmem:[%s993_s1 + $0x38] sm:$0xff] (!%p164_p2)  ;;  %v630_v19 = vld [vmem:[%s993_s1 + $0xb0] sm:$0xff] (!%p164_p2) }
   0xa   : > { %v234_v15 = vld [vmem:[%s993_s1 + $0x28] sm:$0xff] (!%p164_p2)  ;;  %215 = vst.msk [vmem:[#allocation2 + $0x10] sm:$0x3] (!%p164_p2), %vm214_vm1, %v756_v12  ;;  %689 = vmatprep.subr.bf16.mxu0 (!%p164_p2), %v688_v7  ;;  %675 = vmatpush1.bf16.msra.mxu1 (!%p164_p2), %v674_v8  ;;  %v676_v17 = vpack.c.bf16 (!%p164_p2), %v633_v14, %v631_v11  ;;  %v632_v20 = vld [vmem:[%s993_s1 + $0xc0] sm:$0xff] (!%p164_p2)  ;;  %v235_v23 = vld [vmem:[%s993_s1 + $0x30] sm:$0xff] (!%p164_p2) }
   0xb   : > { %v692_v18 = vpack.c.bf16 (!%p164_p2), %v236_v16, %v234_v15  ;;  %v233_v21 = vld [vmem:[%s993_s1 + $0x20] sm:$0xff] (!%p164_p2)  ;;  %691 = vmatpush1.bf16.msra.mxu0 (!%p164_p2), %v690_v13  ;;  %v678_v22 = vpack.c.bf16 (!%p164_p2), %v632_v20, %v630_v19  ;;  %v635_v24 = vld [vmem:[%s993_s1 + $0xd8] sm:$0xff] (!%p164_p2)  ;;  %v637_v25 = vld [vmem:[%s993_s1 + $0xe8] sm:$0xff] (!%p164_p2) }
   0xc   : > { %v206_v28 = vstv (!%p164_p2), %s794_s19  ;;  %677 = vmatprep.subr.bf16.mxu1 (!%p164_p2), %v676_v17  ;;  %v694_v29 = vpack.c.bf16 (!%p164_p2), %v235_v23, %v233_v21  ;;  %v680_v30 = vpack.c.bf16 (!%p164_p2), %v637_v25, %v635_v24  ;;  %v238_v31 = vld [vmem:[%s993_s1 + $0x48] sm:$0xff] (!%p164_p2)  ;;  %v240_v35 = vld [vmem:[%s993_s1 + $0x58] sm:$0xff] (!%p164_p2)  ;;  %v634_v36 = vld [vmem:[%s993_s1 + $0xd0] sm:$0xff] (!%p164_p2) }
   0xd   : > { %693 = vmatprep.subr.bf16.mxu0 (!%p164_p2), %v692_v18  ;;  %v696_v37 = vpack.c.bf16 (!%p164_p2), %v240_v35, %v238_v31  ;;  %v636_v38 = vld [vmem:[%s993_s1 + $0xe0] sm:$0xff] (!%p164_p2)  ;;  %v239_v40 = vld [vmem:[%s993_s1 + $0x50] sm:$0xff] (!%p164_p2)  ;;  %v639_v45 = vld [vmem:[%s993_s1 + $0xf8] sm:$0xff] (!%p164_p2) }
   0xe   : > { %s998_s18 = smov (!%p189_p3, %s617_s18), 1  ;;  %679 = vmatpush1.bf16.msra.mxu1 %v678_v22  ;;  %v237_v39 = vld [vmem:[%s993_s1 + $0x40] sm:$0xff]  ;;  %v682_v44 = vpack.c.bf16 %v636_v38, %v634_v36  ;;  %v641_v46 = vld [vmem:[%s993_s1 + $0x108] sm:$0xff]  ;;  %v244_v50 = vld [vmem:[%s993_s1 + $0x78] sm:$0xff] }
   0xf   : > { %s670_s20 = sshll.u32 %s998_s18, 4  ;;  %695 = vmatpush1.bf16.msra.mxu0 %v694_v29  ;;  %681 = vmatprep.subr.bf16.mxu1 %v680_v30  ;;  %v242_v47 = vld [vmem:[%s993_s1 + $0x68] sm:$0xff]  ;;  %v698_v48 = vpack.c.bf16 %v239_v40, %v237_v39  ;;  %v684_v49 = vpack.c.bf16 %v641_v46, %v639_v45  ;;  %v638_v51 = vld [vmem:[%s993_s1 + $0xf0] sm:$0xff]  ;;  %v640_v52 = vld [vmem:[%s993_s1 + $0x100] sm:$0xff]  ;;  %s671_s9 = sshll.u32 %s998_s18, 5 }
  0x10   : > { %s193_s28 = scalar_lea.vmem %s992_s0, %s670_s20  ;;  %697 = vmatprep.subr.bf16.mxu0 %v696_v37  ;;  %v700_v54 = vpack.c.bf16 %v244_v50, %v242_v47  ;;  %v241_v55 = vld [vmem:[%s993_s1 + $0x60] sm:$0xff]  ;;  %v243_v56 = vld [vmem:[%s993_s1 + $0x70] sm:$0xff]  ;;  %v686_v57 = vpack.c.bf16 %v640_v52, %v638_v51  ;;  %v649_v60 = vld [vmem:[%s993_s1 + $0x128] sm:$0xff] }
  0x11   : > { %v200_v26 = vld [vmem:[%s193_s28] sm:$0xff]  ;;  %v201_v27 = vld [vmem:[%s193_s28 + $0x8] sm:$0xff]  ;;  %v702_v59 = vpack.c.bf16 %v243_v56, %v241_v55  ;;  %v651_v61 = vld [vmem:[%s993_s1 + $0x138] sm:$0xff] }
  0x12   : > { %v202_v32 = vmax.f32 %v200_v26, 0.0  ;;  %v204_v33 = vmin.f32 %v200_v26, 0.0  ;;  %v205_v34 = vmin.f32 %v201_v27, 0.0  ;;  %v203_v43 = vmax.f32 %v201_v27, 0.0  ;;  %683 = vmatpush1.bf16.msra.mxu1 %v682_v44  ;;  %v643_v62 = vld [vmem:[%s993_s1 + $0x118] sm:$0xff]  ;;  %v246_v63 = vld [vmem:[%s993_s1 + $0x88] sm:$0xff] }
  0x13   : > { %699 = vmatpush1.bf16.msra.mxu0 %v698_v48  ;;  %685 = vmatprep.subr.bf16.mxu1 %v684_v49  ;;  %v642_v0 = vld [vmem:[%s993_s1 + $0x110] sm:$0xff]  ;;  %v704_v1 = vpack.c.bf16 %v651_v61, %v649_v60  ;;  %v245_v2 = vld [vmem:[%s993_s1 + $0x80] sm:$0xff]  ;;  %v653_v7 = vld [vmem:[%s993_s1 + $0x148] sm:$0xff] }
  0x14   : > { %v207_v41 = vmul.f32 %v206_v28, %v204_v33  ;;  %v208_v42 = vmul.f32 %v206_v28, %v205_v34  ;;  %701 = vmatprep.subr.bf16.mxu0 %v700_v54  ;;  %v648_v4 = vld [vmem:[%s993_s1 + $0x120] sm:$0xff]  ;;  %v650_v5 = vld [vmem:[%s993_s1 + $0x130] sm:$0xff]  ;;  %v655_v8 = vld [vmem:[%s993_s1 + $0x158] sm:$0xff] }
  0x15   : > { %v706_v9 = vpack.c.bf16 %v650_v5, %v648_v4  ;;  %v652_v10 = vld [vmem:[%s993_s1 + $0x140] sm:$0xff]  ;;  %v654_v11 = vld [vmem:[%s993_s1 + $0x150] sm:$0xff]  ;;  %v657_v13 = vld [vmem:[%s993_s1 + $0x168] sm:$0xff]  ;;  %v708_v16 = vpack.c.bf16 %v655_v8, %v653_v7 }
  0x16   : > { %v209_v53 = vadd.f32 %v207_v41, %v202_v32  ;;  %v210_v58 = vadd.f32 %v208_v42, %v203_v43  ;;  %687 = vmatpush1.bf16.msra.mxu1 %v686_v57  ;;  %v659_v17 = vld [vmem:[%s993_s1 + $0x178] sm:$0xff]  ;;  %v710_v18 = vpack.c.bf16 %v654_v11, %v652_v10  ;;  %v656_v20 = vld [vmem:[%s993_s1 + $0x160] sm:$0xff]  ;;  %v658_v21 = vld [vmem:[%s993_s1 + $0x170] sm:$0xff]  ;;  %v544_v41 = vlaneseq }
  0x17   : > { %703 = vmatpush1.bf16.msra.mxu0 %v702_v59  ;;  %290 = vmatprep.subr.mxu1 %v643_v62  ;;  %v712_v19 = vpack.c.bf16 %v659_v17, %v657_v13  ;;  %v661_v22 = vld [vmem:[%s993_s1 + $0x188] sm:$0xff]  ;;  %v663_v25 = vld [vmem:[%s993_s1 + $0x198] sm:$0xff]  ;;  %v714_v26 = vpack.c.bf16 %v658_v21, %v656_v20  ;;  %v660_v28 = vld [vmem:[%s993_s1 + $0x180] sm:$0xff] }
  0x18   : > { %218 = vrot.lane.b32.xlu0 %v209_v53, %s757_s12  ;;  %373 = vmatprep.subr.mxu0 %v246_v63  ;;  %v716_v27 = vpack.c.bf16 %v663_v25, %v661_v22  ;;  %v662_v29 = vld [vmem:[%s993_s1 + $0x190] sm:$0xff]  ;;  %v665_v31 = vld [vmem:[%s993_s1 + $0x1a8] sm:$0xff]  ;;  %v664_v32 = vld [vmem:[%s993_s1 + $0x1a0] sm:$0xff]  ;;  %v545_v43 = vshrl.u32 %v544_v41, 7 }
  0x19   : > { %v718_v30 = vpack.c.bf16 %v662_v29, %v660_v28  ;;  %v542_v45 = vld [vmem:[%s994_s2] sm:$0x3] }
  0x1a   : > { %291 = vmatpush1.msra.mxu1 %v642_v0  ;;  %v546_v44 = vsub.s32 0, %v545_v43  ;;  %v550_v46 = vsub.s32 1, %v545_v43 }
  0x1b   : > { %374 = vmatpush1.msra.mxu0 %v245_v2  ;;  %720 = vmatprep.subr.bf16.mxu1 %v704_v1 }
  0x1c   : > { %220 = vrot.lane.b32.xlu0 %v210_v58, %s757_s12  ;;  %705 = vmatprep.subr.bf16.mxu0 %v704_v1  ;;  %v547_v47 = vrot.slane %v542_v45, %v546_v44  ;;  %v551_v50 = vrot.slane %v542_v45, %v550_v46  ;;  %s198_s12 = scalar_lea.vmem %s996_s4, %s671_s9 }
  0x8a   : > { %v219_v3 = vpop.permute.xlu0 %218 }
  0x8b   : > { %225 = vst.msk [vmem:[#allocation2 + $0x1] sm:$0xff] %vm224_vm2, %v219_v3 }
  0x8e   : > { %v221_v6 = vpop.permute.xlu0 %220 }
  0x8f   : > { %226 = vst.msk [vmem:[#allocation2 + $0x9] sm:$0xff] %vm224_vm2, %v221_v6 }
  0x92   : > { %v247_v14 = vld [vmem:[#allocation2 + $0x1] sm:$0xff] }
  0x93   : > { %v227_v15 = vld [vmem:[#allocation2] sm:$0xff]  ;;  %644 = vmatmul.mubr.msk.f32.vlgmr.msra.gmra.mrb[0].mxu1 %vm211_vm0, %v247_v14 }
  0x94   : > { %646 = vmatmul.mubr.msk.f32.vlgmr.msra.gmra.mrb[0].mxu0 %vm211_vm0, %v227_v15  ;;  %725 = vmatpush1.bf16.msra.mxu1 %v706_v9 }
  0x95   : > { %707 = vmatpush1.bf16.msra.mxu0 %v706_v9  ;;  %344 = vmatprep.mubr.f32.mxu1 %v756_v12 }
  0x96   : > { %427 = vmatprep.mubr.f32.mxu0 %v756_v12  ;;  %709 = vmatprep.subr.bf16.mxu0 %v708_v16  ;;  %v248_v23 = vld [vmem:[#allocation2 + $0x9] sm:$0xff] }
  0x97   : > { %721 = vmatprep.subr.bf16.mxu1 %v708_v16  ;;  %v228_v24 = vld [vmem:[#allocation2 + $0x8] sm:$0xff]  ;;  %645 = vmatmul.mubr.msk.f32.gmra.mrb[2].mxu1 %vm211_vm0, %v248_v23 }
  0x98   : > { %647 = vmatmul.mubr.msk.f32.gmra.mrb[2].mxu0 %vm211_vm0, %v228_v24  ;;  %726 = vmatpush1.bf16.msra.mxu1 %v710_v18  ;;  %v435_v33 = vld [vmem:[#allocation2 + $0xa] sm:$0xff] }
  0x99   : > { %711 = vmatpush1.bf16.msra.mxu0 %v710_v18  ;;  %722 = vmatprep.subr.bf16.mxu1 %v712_v19 }
  0x9a   : > { %713 = vmatprep.subr.bf16.mxu0 %v712_v19  ;;  %525 = vmatprep.mubr.f32.mxu0 %v756_v12 }
  0x9b   : > { %531 = vmatprep.mubr.f32.mxu1 %v756_v12  ;;  %v434_v12 = vld [vmem:[#allocation2 + $0x2] sm:$0xff] }
  0x9c   : > { %727 = vmatpush1.bf16.msra.mxu1 %v714_v26 }
  0x9d   : > { %715 = vmatpush1.bf16.msra.mxu0 %v714_v26  ;;  %723 = vmatprep.subr.bf16.mxu1 %v716_v27 }
  0x9e   : > { %717 = vmatprep.subr.bf16.mxu0 %v716_v27 }
  0xa0   : > { %728 = vmatpush1.bf16.msra.mxu1 %v718_v30 }
  0xa1   : > { %719 = vmatpush1.bf16.msra.mxu0 %v718_v30  ;;  %724 = vmatprep.subr.mxu1 %v665_v31 }
  0xa2   : > { %477 = vmatprep.subr.mxu0 %v665_v31 }
  0xa4   : > { %729 = vmatpush1.msra.mxu1 %v664_v32 }
  0xa5   : > { %478 = vmatpush1.msra.mxu0 %v664_v32  ;;  %667 = vmatmul.mubr.msk.f32.vlgmr.msra.gmra.mrb[4].mxu1 %vm211_vm0, %v435_v33 }
  0xa6   : > { %666 = vmatmul.mubr.msk.f32.vlgmr.msra.gmra.mrb[0].mxu0 %vm211_vm0, %v434_v12 }
 0x166   : > { %v340_v34 = vpop.f32.mrb[0].mxu1 }
 0x167   : > { %v342_v35 = vpop.f32.mrb[1].mxu1 }
 0x16a   : > { %v346_v36 = vpop.f32.mrb[2].mxu1 }
 0x16b   : > { %v429_v37 = vpop.f32.mrb[2].mxu0  ;;  %v348_v39 = vpop.f32.mrb[3].mxu1 }
 0x16c   : > { %v430_v38 = vadd.f32 %v429_v37, %v346_v36  ;;  %v431_v40 = vpop.f32.mrb[3].mxu0 }
 0x16d   : > { %v432_v42 = vadd.f32 %v431_v40, %v348_v39 }
 0x178   : > { %v533_v49 = vpop.f32.mrb[4].mxu1 }
 0x179   : > { %v527_v48 = vpop.f32.mrb[0].mxu0  ;;  %v540_v52 = vadd.f32 %v533_v49, %v430_v38  ;;  %v535_v54 = vpop.f32.mrb[5].mxu1 }
 0x17a   : > { %v730_v51 = vadd.f32 %v527_v48, %v340_v34  ;;  %v529_v53 = vpop.f32.mrb[1].mxu0  ;;  %v541_v56 = vadd.f32 %v535_v54, %v432_v42 }
 0x17b   : > { %v731_v55 = vadd.f32 %v529_v53, %v342_v35  ;;  %v556_v58 = vadd.f32 %v547_v47, %v540_v52 }
 0x17c   : > { %v554_v57 = vadd.f32 %v730_v51, %v547_v47  ;;  %v557_v60 = vadd.f32 %v551_v50, %v541_v56 }
 0x17d   : > { %v555_v59 = vadd.f32 %v731_v55, %v551_v50  ;;  %560 = vst [vmem:[%s198_s12 + $0x10] sm:$0xff] %v556_v58 }
 0x17e   : > { %558 = vst [vmem:[%s198_s12] sm:$0xff] %v554_v57  ;;  %561 = vst [vmem:[%s198_s12 + $0x18] sm:$0xff] %v557_v60 }
 0x17f   : > { %559 = vst [vmem:[%s198_s12 + $0x8] sm:$0xff] %v555_v59 }
 0x180 PF: > { %s15_s17 = sadd.s32 1, %s754_s17  }
 0x181   : > { %p12_p4 = scmp.ge.s32.totalorder %s15_s17, 4  }
 0x183   :  { %14 = sbr.rel (!%p12_p4) target bundleno = 2 (0x2), region = 68 }

</bundles_post_ra>
